<compile_context>
chip_gen: v7x
topology: tpu7x:2x2x1
jax: 0.10.0
libtpu: 0.0.40
codegen_flags: <defaults>
</compile_context>

<pallas_src>
import jax
import jax.numpy as jnp
from jax import lax
from jax.experimental import pallas as pl
from jax.experimental.pallas import tpu as pltpu

LANE = 128
MAX_BLOCK_ROWS = 8192            # (8192,128) f32 = 4 MiB / input / pipeline buffer
PAD_LOGIT = -1.0e4               # finite: exp(-|x|)=0, log1p=0, max(x,0)=0, -x*y=0
VMEM_LIMIT_BYTES = 32 * 1024 * 1024


def _num_tensorcores():
    """Best-effort TensorCores-per-chip (2 on v7x, 1 on v5e/v6e). Safe default 1."""
    try:
        info = pltpu.get_tpu_info()
    except Exception:
        return 1
    for name in ("num_tensorcores", "tensorcores_per_chip", "num_cores",
                 "cores_per_chip", "core_count"):
        try:
            v = int(getattr(info, name))
        except (AttributeError, TypeError, ValueError):
            continue
        if 1 <= v <= 8:
            return v
    return 1


def _make_kernel(*, steps, nblocks, block_rows, tail_rows, slab, dead_possible):
    """Build the per-shape kernel (all tiling parameters are static Python ints)."""

    def kernel(yp_ref, yt_ref, out_ref):
        c = pl.program_id(0)
        i = pl.program_id(1)

        @pl.when(i == 0)
        def _init():
            out_ref[...] = jnp.zeros_like(out_ref)

        b = c * steps + i            # global block index (>= nblocks only on dead steps)

        def load(r0):
            x = yp_ref[pl.ds(r0, slab), :].astype(jnp.float32)
            y = yt_ref[pl.ds(r0, slab), :].astype(jnp.float32)
            return x, y

        def slab_terms(x, y):
            # One exp per element, shared between stable BCE-with-logits and sigmoid.
            e = jnp.exp(-jnp.abs(x))
            bce = jnp.maximum(x, 0.0) - x * y + jnp.log1p(e)
            # Sigmoid via EUP approximate reciprocal (saves the divide's Newton step).
            p = jnp.where(x >= 0.0, 1.0, e) * pl.reciprocal(1.0 + e, approx=True)

            def fold(v):  # (slab, LANE) -> (8, LANE): pure vreg-wise adds
                return jnp.sum(v.reshape(slab // 8, 8, LANE), axis=0)

            return fold(bce), fold(p * y), fold(p * p), fold(y * y)

        def run(valid_rows):
            # valid_rows: static number of valid rows in this block.
            nfull = valid_rows // slab
            rem = valid_rows - nfull * slab
            zero = jnp.zeros((8, LANE), jnp.float32)
            accs = (zero, zero, zero, zero)

            if nfull > 0:
                def body(s, accs):
                    r0 = pl.multiple_of(s * slab, slab)
                    x, y = load(r0)
                    return tuple(a + t for a, t in zip(accs, slab_terms(x, y)))

                accs = lax.fori_loop(0, nfull, body, accs, unroll=min(4, nfull))

            if rem > 0:
                # Only the (single) partial last block reaches here: rows >= rem in
                # this slab hold stale VMEM from the partial DMA, mask them to values
                # that contribute exactly 0 to every partial sum.
                x, y = load(nfull * slab)
                keep = lax.broadcasted_iota(jnp.int32, (slab, LANE), 0) < rem
                x = jnp.where(keep, x, PAD_LOGIT)
                y = jnp.where(keep, y, 0.0)
                accs = tuple(a + t for a, t in zip(accs, slab_terms(x, y)))

            out_ref[0, 0] += accs[0]
            out_ref[0, 1] += accs[1]
            out_ref[0, 2] += accs[2]
            out_ref[0, 3] += accs[3]

        if tail_rows == block_rows and not dead_possible:
            # Every grid step owns a full, live block (common case): no branches.
            run(block_rows)
        else:
            if nblocks > 1:
                full_pred = (b < nblocks) if tail_rows == block_rows else (b < nblocks - 1)

                @pl.when(full_pred)
                def _full():
                    run(block_rows)

            if tail_rows != block_rows:
                @pl.when(b == nblocks - 1)
                def _tail():
                    run(tail_rows)
            # Dead steps (only when nblocks is odd under a 2-core split) fall through
            # and contribute nothing; their DMA index was clamped to the last block.

    return kernel


def bce_dice_loss(y_pred, y_true, smooth=1e-6, num_cores=None):
    """Scalar loss = BCEWithLogitsLoss(y_pred, y_true) + BinaryDiceLoss(y_pred, y_true)."""
    assert y_pred.shape == y_true.shape
    n = int(y_pred.size)

    flat_p = y_pred.reshape(-1)          # native dtype; f32 cast happens inside the kernel
    flat_t = y_true.reshape(-1)

    # Row granule: 8 sublanes x dtype packing, so DMA boundaries stay tile-aligned
    # and the kernel never needs lane-level masking.
    itemsize = min(jnp.dtype(flat_p.dtype).itemsize, jnp.dtype(flat_t.dtype).itemsize)
    row_granule = 8 * max(1, 4 // max(1, itemsize))
    elem_granule = row_granule * LANE
    n_main = (n // elem_granule) * elem_granule
    rows = n_main // LANE

    sums = jnp.zeros((4,), jnp.float32)  # [sum(bce), sum(p*y), sum(p*p), sum(y*y)]

    if rows > 0:
        main_p = flat_p if n_main == n else lax.slice(flat_p, (0,), (n_main,))
        main_t = flat_t if n_main == n else lax.slice(flat_t, (0,), (n_main,))
        p2 = main_p.reshape(rows, LANE)
        t2 = main_t.reshape(rows, LANE)

        block_rows = rows if rows <= MAX_BLOCK_ROWS else MAX_BLOCK_ROWS
        nblocks = pl.cdiv(rows, block_rows)
        tail_rows = rows - (nblocks - 1) * block_rows

        ncores = int(num_cores) if num_cores is not None else _num_tensorcores()
        ncores = 2 if (ncores >= 2 and nblocks >= 2) else 1
        steps = pl.cdiv(nblocks, ncores)
        dead_possible = (ncores * steps != nblocks)

        # Largest slab (rows per inner-loop iteration) that divides the block.
        slab = next(s for s in (64, 32, 16, 8) if block_rows % s == 0)

        def in_index_map(c, i):
            b = c * steps + i
            if dead_possible:
                b = jnp.minimum(b, nblocks - 1)   # dead steps re-read the last block & skip it
            return (b, 0)

        in_spec = pl.BlockSpec((block_rows, LANE), in_index_map)
        out_spec = pl.BlockSpec((1, 4, 8, LANE), lambda c, i: (c, 0, 0, 0))

        kernel = _make_kernel(steps=steps, nblocks=nblocks, block_rows=block_rows,
                              tail_rows=tail_rows, slab=slab,
                              dead_possible=dead_possible)

        partials = pl.pallas_call(
            kernel,
            out_shape=jax.ShapeDtypeStruct((ncores, 4, 8, LANE), jnp.float32),
            grid_spec=pltpu.PrefetchScalarGridSpec(
                num_scalar_prefetch=0,
                grid=(ncores, steps),
                in_specs=[in_spec, in_spec],
                out_specs=out_spec,
            ),
            compiler_params=pltpu.CompilerParams(
                dimension_semantics=("parallel", "arbitrary"),
                vmem_limit_bytes=VMEM_LIMIT_BYTES,
            ),
        )(p2, t2)

        # Tiny XLA finalize: one cross-lane reduce over the per-core partial rows.
        sums = jnp.sum(partials, axis=(0, 2, 3))

    if n_main != n:
        # < elem_granule trailing elements: folded in by XLA directly (cheaper than
        # padding/copying both full arrays just to round the element count up).
        xr = flat_p[n_main:].astype(jnp.float32)
        yr = flat_t[n_main:].astype(jnp.float32)
        er = jnp.exp(-jnp.abs(xr))
        bce_r = jnp.sum(jnp.maximum(xr, 0.0) - xr * yr + jnp.log1p(er))
        pr = jnp.where(xr >= 0.0, 1.0, er) / (1.0 + er)
        sums = sums + jnp.stack(
            [bce_r, jnp.sum(pr * yr), jnp.sum(pr * pr), jnp.sum(yr * yr)])

    bce_mean = sums[0] / n
    dice_loss = 1.0 - (2.0 * sums[1] + smooth) / (sums[2] + sums[3] + smooth)
    return bce_mean + dice_loss


def _reference(y_pred, y_true, smooth=1e-6):
    x = y_pred.astype(jnp.float32)
    y = y_true.astype(jnp.float32)
    bce = jnp.mean(jnp.maximum(x, 0.0) - x * y + jnp.log1p(jnp.exp(-jnp.abs(x))))
    p = jax.nn.sigmoid(x)
    num = 2.0 * jnp.sum(p * y) + smooth
    den = jnp.sum(p * p) + jnp.sum(y * y) + smooth
    return bce + (1.0 - num / den)


if __name__ == "__main__":
    key = jax.random.PRNGKey(0)
    k1, k2, k3, k4, k5, k6 = jax.random.split(key, 6)
    # Tolerance leaves headroom for the approx-reciprocal sigmoid (<~1e-4 rel)
    # while still catching any structural/accumulation bug.
    TOL = 1e-3

    # 1) aligned NCHW segmentation logits + binary targets (pure kernel path)
    yp1 = jax.random.normal(k1, (2, 4, 16, 16), dtype=jnp.float32)
    yt1 = (jax.random.uniform(k2, (2, 4, 16, 16)) > 0.5).astype(jnp.float32)
    out1 = jax.block_until_ready(bce_dice_loss(yp1, yt1))
    ref1 = jax.block_until_ready(_reference(yp1, yt1))
    assert jnp.allclose(out1, ref1, rtol=TOL, atol=TOL), (out1, ref1)

    # 2) ragged element count: kernel consumes the aligned prefix, the small
    #    tail is folded in by the wrapper (no jnp.pad / full-array copy)
    yp2 = jax.random.normal(k3, (2, 3, 17, 11), dtype=jnp.float32)
    yt2 = (jax.random.uniform(k4, (2, 3, 17, 11)) > 0.5).astype(jnp.float32)
    out2 = jax.block_until_ready(bce_dice_loss(yp2, yt2))
    ref2 = jax.block_until_ready(_reference(yp2, yt2))
    assert jnp.allclose(out2, ref2, rtol=TOL, atol=TOL), (out2, ref2)

    # 3) bf16 inputs stay bf16 in HBM; the f32 cast happens inside the kernel
    yp3 = jax.random.normal(k5, (2, 4, 16, 16), dtype=jnp.bfloat16)
    yt3 = (jax.random.uniform(k6, (2, 4, 16, 16)) > 0.5).astype(jnp.bfloat16)
    out3 = jax.block_until_ready(bce_dice_loss(yp3, yt3))
    ref3 = jax.block_until_ready(_reference(yp3, yt3))
    assert jnp.allclose(out3, ref3, rtol=TOL, atol=TOL), (out3, ref3)

    print("KERNEL_OK")
</pallas_src>

<mosaic_0001>
module attributes {stable_mosaic.version = 11 : i64} {
  func.func @kernel(%arg0: i32, %arg1: i32, %arg2: memref<16x128xf32, #tpu.memory_space<vmem>>, %arg3: memref<16x128xf32, #tpu.memory_space<vmem>>, %arg4: memref<1x4x8x128xf32, #tpu.memory_space<vmem>>) attributes {dimension_semantics = [#tpu.dimension_semantics<parallel>, #tpu.dimension_semantics<arbitrary>], iteration_bounds = array<i64: 1, 1>, scalar_prefetch = 0 : i64, scratch_operands = 0 : i64, tpu.core_type = #tpu.core_type<tc>, window_params = [{transform_indices = @transform_0, window_bounds = array<i64: 16, 128>}, {transform_indices = @transform_1, window_bounds = array<i64: 16, 128>}, {transform_indices = @transform_2, window_bounds = array<i64: 1, 4, 8, 128>}]} {
    %c0_i32 = arith.constant 0 : i32
    %0 = arith.cmpi eq, %arg1, %c0_i32 : i32
    %1 = arith.extui %0 : i1 to i32
    %c0_i32_0 = arith.constant 0 : i32
    %2 = arith.cmpi ne, %1, %c0_i32_0 : i32
    scf.if %2 {
      %cst_41 = arith.constant 0.000000e+00 : f32
      %67 = vector.broadcast %cst_41 : f32 to vector<1x4x8x128xf32>
      %c0_42 = arith.constant 0 : index
      %c0_43 = arith.constant 0 : index
      %c0_44 = arith.constant 0 : index
      %c0_45 = arith.constant 0 : index
      %68 = vector.load %arg4[%c0_42, %c0_43, %c0_44, %c0_45] : memref<1x4x8x128xf32, #tpu.memory_space<vmem>>, vector<1x4x8x128xf32>
      tpu.vector_store %arg4[%c0_42, %c0_43, %c0_44, %c0_45], %67 {strides = array<i32>} : memref<1x4x8x128xf32, #tpu.memory_space<vmem>>, vector<1x4x8x128xf32>,
    } else {
    }
    %cst = arith.constant 0.000000e+00 : f32
    %3 = vector.broadcast %cst : f32 to vector<8x128xf32>
    %c0_i32_1 = arith.constant 0 : i32
    %c16_i32 = arith.constant 16 : i32
    %4 = arith.muli %c0_i32_1, %c16_i32 : i32
    %5 = tpu.assume_multiple %4, 16 : i32
    %6 = arith.index_cast %5 : i32 to index
    %c0 = arith.constant 0 : index
    %7 = vector.load %arg2[%6, %c0] : memref<16x128xf32, #tpu.memory_space<vmem>>, vector<16x128xf32>
    %8 = arith.index_cast %5 : i32 to index
    %c0_2 = arith.constant 0 : index
    %9 = vector.load %arg3[%8, %c0_2] : memref<16x128xf32, #tpu.memory_space<vmem>>, vector<16x128xf32>
    %10 = math.absf %7 : vector<16x128xf32>
    %cst_3 = arith.constant 0.000000e+00 : f32
    %11 = vector.broadcast %cst_3 : f32 to vector<16x128xf32>
    %12 = arith.subf %11, %10 : vector<16x128xf32>
    %13 = math.exp %12 : vector<16x128xf32>
    %cst_4 = arith.constant 0.000000e+00 : f32
    %14 = vector.broadcast %cst_4 : f32 to vector<16x128xf32>
    %15 = arith.maximumf %7, %14 : vector<16x128xf32>
    %16 = arith.mulf %7, %9 : vector<16x128xf32>
    %17 = arith.subf %15, %16 : vector<16x128xf32>
    %18 = math.log1p %13 : vector<16x128xf32>
    %19 = arith.addf %17, %18 : vector<16x128xf32>
    %cst_5 = arith.constant 0.000000e+00 : f32
    %20 = vector.broadcast %cst_5 : f32 to vector<16x128xf32>
    %21 = arith.cmpf oge, %7, %20 : vector<16x128xf32>
    %cst_6 = arith.constant 1.000000e+00 : f32
    %22 = vector.broadcast %cst_6 : f32 to vector<16x128xf32>
    %23 = arith.select %21, %22, %13 : vector<16x128xi1>, vector<16x128xf32>
    %cst_7 = arith.constant 1.000000e+00 : f32
    %24 = vector.broadcast %cst_7 : f32 to vector<16x128xf32>
    %25 = arith.addf %24, %13 : vector<16x128xf32>
    %26 = tpu.reciprocal %25 {approx = true} : vector<16x128xf32> -> vector<16x128xf32>
    %27 = arith.mulf %23, %26 : vector<16x128xf32>
    %28 = vector.shape_cast %19 : vector<16x128xf32> to vector<2x8x128xf32>
    %cst_8 = arith.constant dense<0.000000e+00> : vector<8x128xf32>
    %29 = vector.multi_reduction <add>, %28, %cst_8 [0] : vector<2x8x128xf32> to vector<8x128xf32>
    %30 = arith.mulf %27, %9 : vector<16x128xf32>
    %31 = vector.shape_cast %30 : vector<16x128xf32> to vector<2x8x128xf32>
    %cst_9 = arith.constant dense<0.000000e+00> : vector<8x128xf32>
    %32 = vector.multi_reduction <add>, %31, %cst_9 [0] : vector<2x8x128xf32> to vector<8x128xf32>
    %33 = arith.mulf %27, %27 : vector<16x128xf32>
    %34 = vector.shape_cast %33 : vector<16x128xf32> to vector<2x8x128xf32>
    %cst_10 = arith.constant dense<0.000000e+00> : vector<8x128xf32>
    %35 = vector.multi_reduction <add>, %34, %cst_10 [0] : vector<2x8x128xf32> to vector<8x128xf32>
    %36 = arith.mulf %9, %9 : vector<16x128xf32>
    %37 = vector.shape_cast %36 : vector<16x128xf32> to vector<2x8x128xf32>
    %cst_11 = arith.constant dense<0.000000e+00> : vector<8x128xf32>
    %38 = vector.multi_reduction <add>, %37, %cst_11 [0] : vector<2x8x128xf32> to vector<8x128xf32>
    %39 = arith.addf %3, %29 : vector<8x128xf32>
    %40 = arith.addf %3, %32 : vector<8x128xf32>
    %41 = arith.addf %3, %35 : vector<8x128xf32>
    %42 = arith.addf %3, %38 : vector<8x128xf32>
    %c1_i32 = arith.constant 1 : i32
    %c0_12 = arith.constant 0 : index
    %c0_13 = arith.constant 0 : index
    %c0_14 = arith.constant 0 : index
    %c0_15 = arith.constant 0 : index
    %43 = vector.load %arg4[%c0_12, %c0_13, %c0_14, %c0_15] : memref<1x4x8x128xf32, #tpu.memory_space<vmem>>, vector<1x1x8x128xf32>
    %44 = vector.shape_cast %43 : vector<1x1x8x128xf32> to vector<8x128xf32>
    %45 = arith.addf %44, %39 : vector<8x128xf32>
    %c0_16 = arith.constant 0 : index
    %c0_17 = arith.constant 0 : index
    %c0_18 = arith.constant 0 : index
    %c0_19 = arith.constant 0 : index
    %46 = vector.load %arg4[%c0_16, %c0_17, %c0_18, %c0_19] : memref<1x4x8x128xf32, #tpu.memory_space<vmem>>, vector<1x1x8x128xf32>
    %47 = vector.shape_cast %46 : vector<1x1x8x128xf32> to vector<8x128xf32>
    %48 = vector.shape_cast %45 : vector<8x128xf32> to vector<1x1x8x128xf32>
    tpu.vector_store %arg4[%c0_16, %c0_17, %c0_18, %c0_19], %48 {strides = array<i32>} : memref<1x4x8x128xf32, #tpu.memory_space<vmem>>, vector<1x1x8x128xf32>,
    %c0_20 = arith.constant 0 : index
    %c1 = arith.constant 1 : index
    %c0_21 = arith.constant 0 : index
    %c0_22 = arith.constant 0 : index
    %49 = vector.load %arg4[%c0_20, %c1, %c0_21, %c0_22] : memref<1x4x8x128xf32, #tpu.memory_space<vmem>>, vector<1x1x8x128xf32>
    %50 = vector.shape_cast %49 : vector<1x1x8x128xf32> to vector<8x128xf32>
    %51 = arith.addf %50, %40 : vector<8x128xf32>
    %c0_23 = arith.constant 0 : index
    %c1_24 = arith.constant 1 : index
    %c0_25 = arith.constant 0 : index
    %c0_26 = arith.constant 0 : index
    %52 = vector.load %arg4[%c0_23, %c1_24, %c0_25, %c0_26] : memref<1x4x8x128xf32, #tpu.memory_space<vmem>>, vector<1x1x8x128xf32>
    %53 = vector.shape_cast %52 : vector<1x1x8x128xf32> to vector<8x128xf32>
    %54 = vector.shape_cast %51 : vector<8x128xf32> to vector<1x1x8x128xf32>
    tpu.vector_store %arg4[%c0_23, %c1_24, %c0_25, %c0_26], %54 {strides = array<i32>} : memref<1x4x8x128xf32, #tpu.memory_space<vmem>>, vector<1x1x8x128xf32>,
    %c0_27 = arith.constant 0 : index
    %c2 = arith.constant 2 : index
    %c0_28 = arith.constant 0 : index
    %c0_29 = arith.constant 0 : index
    %55 = vector.load %arg4[%c0_27, %c2, %c0_28, %c0_29] : memref<1x4x8x128xf32, #tpu.memory_space<vmem>>, vector<1x1x8x128xf32>
    %56 = vector.shape_cast %55 : vector<1x1x8x128xf32> to vector<8x128xf32>
    %57 = arith.addf %56, %41 : vector<8x128xf32>
    %c0_30 = arith.constant 0 : index
    %c2_31 = arith.constant 2 : index
    %c0_32 = arith.constant 0 : index
    %c0_33 = arith.constant 0 : index
    %58 = vector.load %arg4[%c0_30, %c2_31, %c0_32, %c0_33] : memref<1x4x8x128xf32, #tpu.memory_space<vmem>>, vector<1x1x8x128xf32>
    %59 = vector.shape_cast %58 : vector<1x1x8x128xf32> to vector<8x128xf32>
    %60 = vector.shape_cast %57 : vector<8x128xf32> to vector<1x1x8x128xf32>
    tpu.vector_store %arg4[%c0_30, %c2_31, %c0_32, %c0_33], %60 {strides = array<i32>} : memref<1x4x8x128xf32, #tpu.memory_space<vmem>>, vector<1x1x8x128xf32>,
    %c0_34 = arith.constant 0 : index
    %c3 = arith.constant 3 : index
    %c0_35 = arith.constant 0 : index
    %c0_36 = arith.constant 0 : index
    %61 = vector.load %arg4[%c0_34, %c3, %c0_35, %c0_36] : memref<1x4x8x128xf32, #tpu.memory_space<vmem>>, vector<1x1x8x128xf32>
    %62 = vector.shape_cast %61 : vector<1x1x8x128xf32> to vector<8x128xf32>
    %63 = arith.addf %62, %42 : vector<8x128xf32>
    %c0_37 = arith.constant 0 : index
    %c3_38 = arith.constant 3 : index
    %c0_39 = arith.constant 0 : index
    %c0_40 = arith.constant 0 : index
    %64 = vector.load %arg4[%c0_37, %c3_38, %c0_39, %c0_40] : memref<1x4x8x128xf32, #tpu.memory_space<vmem>>, vector<1x1x8x128xf32>
    %65 = vector.shape_cast %64 : vector<1x1x8x128xf32> to vector<8x128xf32>
    %66 = vector.shape_cast %63 : vector<8x128xf32> to vector<1x1x8x128xf32>
    tpu.vector_store %arg4[%c0_37, %c3_38, %c0_39, %c0_40], %66 {strides = array<i32>} : memref<1x4x8x128xf32, #tpu.memory_space<vmem>>, vector<1x1x8x128xf32>,
    return
  }
  func.func @transform_0(%arg0: i32, %arg1: i32) -> (i32, i32) {
    %c1_i32 = arith.constant 1 : i32
    %0 = arith.muli %arg0, %c1_i32 : i32
    %1 = arith.addi %0, %arg1 : i32
    %c0_i32 = arith.constant 0 : i32
    %c0_i32_0 = arith.constant 0 : i32
    return %1, %c0_i32 : i32, i32
  }
  func.func @transform_1(%arg0: i32, %arg1: i32) -> (i32, i32) {
    %c1_i32 = arith.constant 1 : i32
    %0 = arith.muli %arg0, %c1_i32 : i32
    %1 = arith.addi %0, %arg1 : i32
    %c0_i32 = arith.constant 0 : i32
    %c0_i32_0 = arith.constant 0 : i32
    return %1, %c0_i32 : i32, i32
  }
  func.func @transform_2(%arg0: i32, %arg1: i32) -> (i32, i32, i32, i32) {
    %c0_i32 = arith.constant 0 : i32
    %c0_i32_0 = arith.constant 0 : i32
    %c0_i32_1 = arith.constant 0 : i32
    %c0_i32_2 = arith.constant 0 : i32
    return %arg0, %c0_i32, %c0_i32_0, %c0_i32_1 : i32, i32, i32, i32
  }
}

</mosaic_0001>

<bundles_post_ra>
// kernel: tpu_custom_call.1
= control target key start
LH: loop header
LB: loop body
LE: loop exit
PB: predicated region body
PF: predicated region fallthrough
CT: control target
= control target key end

     0   :  { %7 = vsyncpa [#allocation3], 0  ;;  %s310_s0 = inlined_call_operand.hbm [shape: f32[16,128], index: 0, kind: input, shape index: {}]   ;;  %s311_s1 = inlined_call_operand.hbm [shape: f32[16,128], index: 1, kind: input, shape index: {}]   ;;  %s312_s2 = inlined_call_operand.hbm [shape: f32[1,4,8,128], index: 2, kind: output, shape index: {}]  }
   0x1   :  { %8 = vsyncpa [#allocation6], 0 }
   0x2   :  { %9 = vsyncpa [#allocation4], 0  ;;  %s245_s9 = smov [#allocation2]   ;;  %s173_s13 = scalar_lea.hbm %s310_s0, 256 }
   0x3   :  { %s19_s10 = sshll.u32 %s245_s9, 4  ;;  %p174_p0 = scmp.ne.s32.totalorder %s310_s0, %s173_s13  ;;  %s20_s10 = int_to_ptr.vmem [resolvable:$true] %s19_s10 }
   0x4   :  { %p177_p1 = scmp.lt.u32.totalorder %s173_s13, %s310_s0 }
   0x6   :  { %p179_p2 = pnand %p177_p1, %p174_p0 }
   0x8   :  { %182 = shalt.err (!%p179_p2)
}
   0x9   :  { %s183_s18 = scalar_lea.vmem %s20_s10, 256  ;;  %p188_p4 = scmp.lt.s32.totalorder %s20_s10, %s20_s10 }
   0xa   :  { %p184_p3 = scmp.ne.s32.totalorder %s20_s10, %s183_s18  ;;  %p189_p5 = scmp.lt.s32.totalorder %s183_s18, %s183_s18 }
   0xc   :  { %p190_p6 = por %p189_p5, %p188_p4 }
   0xe   :  { %p191_p7 = pnand %p190_p6, %p184_p3 }
  0x10   :  { %194 = shalt.err (!%p191_p7)
}
  0x11   :  { %s246_s19 = smov 128   ;;  %s247_s20 = smov 8  }
  0x12   :  { %25 = dma.hbm_to_vmem [thread:$0]  %s310_s0, 256, %s20_s10, [#allocation3], %s246_s19, %s246_s19, %s247_s20  }
  0x13   :  { %s248_s23 = smov [#allocation5]   ;;  %s195_s27 = scalar_lea.hbm %s311_s1, 256 }
  0x14   :  { %s35_s24 = sshll.u32 %s248_s23, 4  ;;  %p196_p8 = scmp.ne.s32.totalorder %s311_s1, %s195_s27  ;;  %s36_s24 = int_to_ptr.vmem [resolvable:$true] %s35_s24 }
  0x15   :  { %p199_p9 = scmp.lt.u32.totalorder %s195_s27, %s311_s1 }
  0x17   :  { %p201_p10 = pnand %p199_p9, %p196_p8 }
  0x19   :  { %204 = shalt.err (!%p201_p10)
}
  0x1a   :  { %s205_s4 = scalar_lea.vmem %s36_s24, 256  ;;  %p210_p12 = scmp.lt.s32.totalorder %s36_s24, %s36_s24 }
  0x1b   :  { %p206_p11 = scmp.ne.s32.totalorder %s36_s24, %s205_s4  ;;  %p211_p13 = scmp.lt.s32.totalorder %s205_s4, %s205_s4 }
  0x1d   :  { %p212_p0 = por %p211_p13, %p210_p12 }
  0x1f   :  { %p213_p1 = pnand %p212_p0, %p206_p11 }
  0x21   :  { %216 = shalt.err (!%p213_p1)
}
  0x22   :  { %41 = dma.hbm_to_vmem [thread:$0]  %s311_s1, 256, %s36_s24, [#allocation6], %s246_s19, %s246_s19, %s247_s20  }
  0x23   :  { %239 = dma.done.wait [#allocation3], 256  }
  0x24   :  { %240 = vsyncadd [#allocation3], 4294967040 }
  0x25   :  { %241 = dma.done.wait [#allocation6], 256  }
  0x26   :  { %242 = vsyncadd [#allocation6], 4294967040  ;;  %v60_v0 = vld [vmem:[#allocation2] sm:$0xff]  ;;  %v61_v1 = vld [vmem:[#allocation2 + $0x8] sm:$0xff]  ;;  %s249_s1 = smov [#allocation7]  }
  0x27   :  { %v64_v2 = vand.u32 2147483647, %v60_v0  ;;  %v65_v3 = vand.u32 2147483647, %v61_v1  ;;  %v62_v4 = vld [vmem:[#allocation5] sm:$0xff]  ;;  %v63_v5 = vld [vmem:[#allocation5 + $0x8] sm:$0xff] }
  0x28   :  { %v115_v8 = vmul.f32 %v62_v4, %v62_v4  ;;  %v116_v9 = vmul.f32 %v63_v5, %v63_v5  ;;  %v72_v20 = vmax.f32 %v60_v0, 0.0  ;;  %v74_v21 = vmul.f32 %v62_v4, %v60_v0  ;;  %s142_s6 = sshll.u32 %s249_s1, 4  ;;  %s143_s6 = int_to_ptr.vmem [resolvable:$true] %s142_s6 }
  0x29   :  { %v66_v6 = vsub.f32 0.0, %v64_v2  ;;  %v67_v7 = vsub.f32 0.0, %v65_v3  ;;  %v73_v24 = vmax.f32 %v61_v1, 0.0  ;;  %v75_v25 = vmul.f32 %v63_v5, %v61_v1  ;;  %s217_s7 = scalar_lea.vmem %s143_s6, 512  ;;  %p222_p3 = scmp.lt.s32.totalorder %s143_s6, %s143_s6 }
  0x2a   :  { %v117_v12 = vadd.f32 %v116_v9, %v115_v8  ;;  %vm98_vm0 = vcmp.ge.f32.partialorder %v60_v0, 0.0  ;;  %vm99_vm1 = vcmp.ge.f32.partialorder %v61_v1, 0.0  ;;  %v76_v29 = vsub.f32 %v72_v20, %v74_v21  ;;  %p218_p2 = scmp.ne.s32.totalorder %s143_s6, %s217_s7  ;;  %p223_p4 = scmp.lt.s32.totalorder %s217_s7, %s217_s7 }
  0x2b   :  { %v68_v10 = vmul.f32 1.442695, %v66_v6  ;;  %v70_v11 = vmul.f32 1.442695, %v67_v7  ;;  %v77_v33 = vsub.f32 %v73_v24, %v75_v25 }
  0x2c   :  { %136 = vst [vmem:[#allocation7 + $0x18] sm:$0xff] %v117_v12  ;;  %p224_p5 = por %p223_p4, %p222_p3 }
  0x2d   :  { %161 = vpow2.f32 %v68_v10 }
  0x2e   :  { %163 = vpow2.f32 %v70_v11  ;;  %p225_p6 = pnand %p224_p5, %p218_p2 }
  0x37   :  { %v162_v13 = vpop.eup %161 }
  0x38   :  { %v164_v14 = vpop.eup %163  ;;  %v78_v15 = vadd.f32 1.0, %v162_v13  ;;  %v81_v17 = vmul.f32 -0.5, %v162_v13  ;;  %v84_v22 = vand.u32 2147483647, %v162_v13  ;;  %v100_v31 = vsel %vm98_vm0, 1.0, %v162_v13 }
  0x39   :  { %v87_v16 = vadd.f32 1.0, %v164_v14  ;;  %v90_v18 = vmul.f32 -0.5, %v164_v14  ;;  %v93_v26 = vand.u32 2147483647, %v164_v14  ;;  %v101_v35 = vsel %vm99_vm1, 1.0, %v164_v14 }
  0x3a   :  { %165 = vlog2.f32 %v78_v15  ;;  %v82_v19 = vadd.f32 1.0, %v81_v17  ;;  %vm85_vm2 = vcmp.lt.f32.partialorder %v84_v22, 0.0004427343 }
  0x3b   :  { %167 = vlog2.f32 %v87_v16  ;;  %v91_v23 = vadd.f32 1.0, %v90_v18  ;;  %vm94_vm3 = vcmp.lt.f32.partialorder %v93_v26, 0.0004427343 }
  0x3c   :  { %169 = vrcp.f32 %v78_v15  ;;  %v83_v27 = vmul.f32 %v162_v13, %v82_v19 }
  0x3d   :  { %171 = vrcp.f32 %v87_v16  ;;  %v92_v30 = vmul.f32 %v164_v14, %v91_v23 }
  0x44   :  { %v166_v28 = vpop.eup %165 }
  0x45   :  { %v168_v32 = vpop.eup %167  ;;  %v80_v34 = vmul.f32 0.6931472, %v166_v28 }
  0x46   :  { %v170_v36 = vpop.eup %169  ;;  %v89_v37 = vmul.f32 0.6931472, %v168_v32 }
  0x47   :  { %v172_v38 = vpop.eup %171  ;;  %v86_v39 = vsel %vm85_vm2, %v83_v27, %v80_v34  ;;  %v106_v40 = vmul.f32 %v170_v36, %v100_v31 }
  0x48   :  { %v95_v41 = vsel %vm94_vm3, %v92_v30, %v89_v37  ;;  %v96_v42 = vadd.f32 %v86_v39, %v76_v29  ;;  %v107_v43 = vmul.f32 %v172_v38, %v101_v35 }
  0x49   :  { %v97_v44 = vadd.f32 %v95_v41, %v77_v33  ;;  %v109_v45 = vmul.f32 %v106_v40, %v62_v4  ;;  %v112_v46 = vmul.f32 %v106_v40, %v106_v40 }
  0x4a   :  { %v110_v47 = vmul.f32 %v107_v43, %v63_v5  ;;  %v113_v48 = vmul.f32 %v107_v43, %v107_v43 }
  0x4b   :  { %v108_v49 = vadd.f32 %v97_v44, %v96_v42 }
  0x4c   :  { %v111_v50 = vadd.f32 %v110_v47, %v109_v45  ;;  %v114_v51 = vadd.f32 %v113_v48, %v112_v46 }
  0x4d   :  { %124 = vst [vmem:[#allocation7] sm:$0xff] %v108_v49 }
  0x4e   :  { %128 = vst [vmem:[#allocation7 + $0x8] sm:$0xff] %v111_v50  ;;  %132 = vst [vmem:[#allocation7 + $0x10] sm:$0xff] %v114_v51 }
  0x4f   :  { %228 = shalt.err (!%p225_p6)
}
  0x50   :  { %s229_s10 = scalar_lea.hbm %s312_s2, 512 }
  0x51   :  { %p230_p7 = scmp.ne.s32.totalorder %s312_s2, %s229_s10  ;;  %p233_p8 = scmp.lt.u32.totalorder %s229_s10, %s312_s2 }
  0x53   :  { %p235_p9 = pnand %p233_p8, %p230_p7 }
  0x55   :  { %238 = shalt.err (!%p235_p9)
}
  0x56   :  { %148 = dma.vmem_to_hbm [thread:$0]  %s143_s6, 512, %s312_s2, [#allocation4], %s246_s19, %s246_s19, %s247_s20  }
  0x57   :  { %243 = dma.done.wait [#allocation4], 512  }
  0x58   :  { %244 = vsyncadd [#allocation4], 4294966784 }
  0x59   :  { %152 = vsyncpa [#allocation3], 1 }
  0x5a   :  { %153 = vsyncpa [#allocation6], 1 }
  0x5b   :  { %154 = vsyncpa [#allocation4], 1 }

</bundles_post_ra>
